<compile_context>
chip_gen: v7x
topology: tpu7x:2x2x1
jax: 0.10.0
libtpu: 0.0.40
codegen_flags: <defaults>
</compile_context>

<pallas_src>
import jax
import jax.numpy as jnp
from jax.experimental import pallas as pl
from jax.experimental.pallas import tpu as pltpu


def _perceptron_kernel(x_ref, w_ref, b_ref, out_ref):
    # x_ref: (TB, F) f32 VMEM, w_ref: (1, F) f32 VMEM, b_ref: (1,) f32 SMEM,
    # out_ref: (TB, 1) i32 VMEM
    x = x_ref[...]                                   # (TB, F)
    w = w_ref[...]                                   # (1, F) broadcasts over rows
    # VPU multiply + XLU lane reduction (no MXU, no transpose): (TB, 1) f32
    s = jnp.sum(x * w, axis=-1, keepdims=True)
    # Heaviside step with the bias folded into the threshold: s + b >= 0  <=>  s >= -b
    neg_b = -b_ref[0]
    out_ref[...] = (s >= neg_b).astype(jnp.int32)


def perceptron_forward(x, weight, bias, *, block_b=512):
    """x: (B, F) f32, weight: (1, F) f32, bias: (1,) f32 -> (B,) int32 predictions."""
    B, F = x.shape

    if B <= block_b:
        TB = B                      # single block: block_shape == array shape (no 8-div rule)
    else:
        assert block_b % 8 == 0, "block_b must be a multiple of 8 when tiling the batch"
        TB = block_b
    num_blocks = pl.cdiv(B, TB)

    # VMEM budget: double-buffered x block + resident weight + output blocks + headroom,
    # capped below v7x's 64 MiB physical VMEM (raises v5e's 16 MiB scoped default if needed).
    vmem_needed = 2 * (TB * F * 4) + 2 * (F * 4) + 2 * (TB * 4)
    vmem_limit = int(min(max(vmem_needed + (4 << 20), 16 << 20), 64 << 20))

    out = pl.pallas_call(
        _perceptron_kernel,
        out_shape=jax.ShapeDtypeStruct((B, 1), jnp.int32),
        grid_spec=pl.GridSpec(
            grid=(num_blocks,),
            in_specs=[
                pl.BlockSpec((TB, F), lambda i: (i, 0)),            # x: tiled over batch
                pl.BlockSpec((1, F), lambda i: (0, 0)),             # weight: stays resident
                pl.BlockSpec(memory_space=pltpu.MemorySpace.SMEM),  # bias: scalar in SMEM
            ],
            out_specs=pl.BlockSpec((TB, 1), lambda i: (i, 0)),
        ),
        compiler_params=pltpu.CompilerParams(
            dimension_semantics=("parallel",),   # batch blocks are independent (v7x 2 TCs)
            vmem_limit_bytes=vmem_limit,
        ),
        cost_estimate=pl.CostEstimate(
            flops=2 * B * F,
            transcendentals=0,
            bytes_accessed=4 * B * F + 4 * F + 4 * B,
        ),
    )(x, weight, bias)
    return out.reshape(B)


if __name__ == "__main__":
    key = jax.random.PRNGKey(0)

    def run_case(B, F, block_b):
        kx, kw, kb = jax.random.split(jax.random.fold_in(key, B * 100003 + F), 3)
        x = jax.random.normal(kx, (B, F), dtype=jnp.float32)

        # Deterministic nn.Linear-style init: U(-1/sqrt(F), 1/sqrt(F))
        bound = 1.0 / float(F) ** 0.5
        weight = jax.random.uniform(kw, (1, F), minval=-bound, maxval=bound,
                                    dtype=jnp.float32)
        bias = jax.random.uniform(kb, (1,), minval=-bound, maxval=bound,
                                  dtype=jnp.float32)

        preds = perceptron_forward(x, weight, bias, block_b=block_b)
        preds = jax.block_until_ready(preds)

        # Reference in plain JAX; allow disagreement only for scores within float
        # rounding of the decision boundary (different but valid accumulation order).
        score = (x @ weight.T + bias).reshape(B)
        ref = (score >= 0.0).astype(jnp.int32)
        near_boundary = jnp.abs(score) < 1e-5
        assert preds.shape == (B,)
        assert preds.dtype == jnp.int32
        assert bool(jnp.all((preds == ref) | near_boundary))

    run_case(8, 32, 512)       # small shape, single-block path (B <= block)
    run_case(1024, 256, 256)   # multi-block path: 4 pipelined batch tiles

    print("KERNEL_OK")
</pallas_src>

<mosaic_0001>
module attributes {stable_mosaic.version = 11 : i64} {
  func.func @_perceptron_kernel(%arg0: i32, %arg1: memref<8x32xf32, #tpu.memory_space<vmem>>, %arg2: memref<1x32xf32, #tpu.memory_space<vmem>>, %arg3: memref<1xf32, #tpu.memory_space<smem>>, %arg4: memref<8x1xi32, #tpu.memory_space<vmem>>) attributes {dimension_semantics = [#tpu.dimension_semantics<parallel>], iteration_bounds = array<i64: 1>, scalar_prefetch = 0 : i64, scratch_operands = 0 : i64, tpu.core_type = #tpu.core_type<tc>, window_params = [{transform_indices = @transform_0, window_bounds = array<i64: 8, 32>}, {pipeline_mode = #tpu.pipeline_mode<synchronous>, transform_indices = @transform_1, window_bounds = array<i64: 1, 32>}, {transform_indices = @transform_2, window_bounds = array<i64: 1>}, {transform_indices = @transform_3, window_bounds = array<i64: 8, 1>}]} {
    %c0 = arith.constant 0 : index
    %c0_0 = arith.constant 0 : index
    %0 = vector.load %arg1[%c0, %c0_0] : memref<8x32xf32, #tpu.memory_space<vmem>>, vector<8x32xf32>
    %c0_1 = arith.constant 0 : index
    %c0_2 = arith.constant 0 : index
    %1 = vector.load %arg2[%c0_1, %c0_2] : memref<1x32xf32, #tpu.memory_space<vmem>>, vector<1x32xf32>
    %2 = vector.broadcast %1 : vector<1x32xf32> to vector<8x32xf32>
    %3 = arith.mulf %0, %2 : vector<8x32xf32>
    %cst = arith.constant dense<0.000000e+00> : vector<8xf32>
    %4 = vector.multi_reduction <add>, %3, %cst [1] : vector<8x32xf32> to vector<8xf32>
    %5 = vector.shape_cast %4 : vector<8xf32> to vector<8x1xf32>
    %c0_3 = arith.constant 0 : index
    %6 = memref.load %arg3[%c0_3] : memref<1xf32, #tpu.memory_space<smem>>
    %cst_4 = arith.constant 0.000000e+00 : f32
    %7 = arith.subf %cst_4, %6 : f32
    %8 = vector.broadcast %7 : f32 to vector<8x1xf32>
    %9 = arith.cmpf oge, %5, %8 : vector<8x1xf32>
    %10 = arith.extui %9 : vector<8x1xi1> to vector<8x1xi32>
    %c0_5 = arith.constant 0 : index
    %c0_6 = arith.constant 0 : index
    %11 = vector.load %arg4[%c0_5, %c0_6] : memref<8x1xi32, #tpu.memory_space<vmem>>, vector<8x1xi32>
    tpu.vector_store %arg4[%c0_5, %c0_6], %10 {strides = array<i32>} : memref<8x1xi32, #tpu.memory_space<vmem>>, vector<8x1xi32>,
    return
  }
  func.func @transform_0(%arg0: i32) -> (i32, i32) {
    %c0_i32 = arith.constant 0 : i32
    %c0_i32_0 = arith.constant 0 : i32
    return %arg0, %c0_i32 : i32, i32
  }
  func.func @transform_1(%arg0: i32) -> (i32, i32) {
    %c0_i32 = arith.constant 0 : i32
    %c0_i32_0 = arith.constant 0 : i32
    %c0_i32_1 = arith.constant 0 : i32
    return %c0_i32, %c0_i32_0 : i32, i32
  }
  func.func @transform_2(%arg0: i32) -> i32 {
    %c0_i32 = arith.constant 0 : i32
    %c0_i32_0 = arith.constant 0 : i32
    return %c0_i32 : i32
  }
  func.func @transform_3(%arg0: i32) -> (i32, i32) {
    %c0_i32 = arith.constant 0 : i32
    %c0_i32_0 = arith.constant 0 : i32
    return %arg0, %c0_i32 : i32, i32
  }
}

</mosaic_0001>

<bundles_post_ra>
// kernel: tpu_custom_call.1
= control target key start
LH: loop header
LB: loop body
LE: loop exit
PB: predicated region body
PF: predicated region fallthrough
CT: control target
= control target key end

     0   :  { %9 = vsyncpa [#allocation4], 0  ;;  %s79_s12 = smov [#allocation3]   ;;  %s122_s0 = inlined_call_operand.hbm [shape: f32[8,32], index: 0, kind: input, shape index: {}]   ;;  %s123_s1 = inlined_call_operand.vmem [shape: f32[1,32], index: 1, kind: input, shape index: {}]   ;;  %s124_s2 = inlined_call_operand.<no memory space> [shape: f32[1], index: 2, kind: input, shape index: {}]   ;;  %s125_s3 = inlined_call_operand.vmem [shape: s32[8,1], index: 3, kind: output, shape index: {}]  }
   0x1   :  { %s16_s13 = sshll.u32 %s79_s12, 4  ;;  %s55_s16 = scalar_lea.hbm %s122_s0, 128  ;;  %s17_s13 = int_to_ptr.vmem [resolvable:$true] %s16_s13 }
   0x2   :  { %p56_p0 = scmp.ne.s32.totalorder %s122_s0, %s55_s16  ;;  %p59_p1 = scmp.lt.u32.totalorder %s55_s16, %s122_s0 }
   0x4   :  { %p61_p2 = pnand %p59_p1, %p56_p0 }
   0x6   :  { %64 = shalt.err (!%p61_p2)
}
   0x7   :  { %s65_s21 = scalar_lea.vmem %s17_s13, 128  ;;  %p70_p4 = scmp.lt.s32.totalorder %s17_s13, %s17_s13 }
   0x8   :  { %p66_p3 = scmp.ne.s32.totalorder %s17_s13, %s65_s21  ;;  %p71_p5 = scmp.lt.s32.totalorder %s65_s21, %s65_s21 }
   0xa   :  { %p72_p6 = por %p71_p5, %p70_p4 }
   0xc   :  { %p73_p7 = pnand %p72_p6, %p66_p3 }
   0xe   :  { %76 = shalt.err (!%p73_p7)
}
   0xf   :  { %19 = dma.hbm_to_vmem [thread:$0]  %s122_s0, 128, %s17_s13, [#allocation4]  }
  0x10   :  { %77 = dma.done.wait [#allocation4], 128  }
  0x11   :  { %78 = vsyncadd [#allocation4], 4294967168  ;;  %v27_v0 = vld [vmem:[#allocation3] sm:$0xff]  ;;  %vm36_vm0 = vcmask 261120   ;;  %s41_s28 = ssub.f32 0.0, %s124_s2  ;;  %vm45_vm1 = vcmask 7168  }
  0x12   :  { %v52_v1 = vld [vmem:[%s123_s1] ss:$0 sm:$0xff]  ;;  %v80_v6 = vmov 0  }
  0x13   :  { %v35_v2 = vmul.f32 %v52_v1, %v27_v0  ;;  %v42_v4 = vstv %s41_s28 }
  0x15   :  { %v37_v3 = vsel %vm36_vm0, %v35_v2, 0.0 }
  0x16   :  { %38 = vadd.xlane.f32.xlu0 %v37_v3 }
  0xa3   :  { %v39_v5 = vpop.xlane.xlu0 %38 }
  0xa4   :  { %vm43_vm2 = vcmp.ge.f32.partialorder %v39_v5, %v42_v4 }
  0xa5   :  { %v44_v7 = vsel %vm43_vm2, 1, %v80_v6 }
  0xa6   :  { %46 = vst.msk [vmem:[%s125_s3] sm:$0xff] %vm45_vm1, %v44_v7 }
  0xa7   :  { %51 = vsyncpa [#allocation4], 1 }

</bundles_post_ra>
